<compile_context>
chip_gen: v5e
topology: v5e:2x2
jax: 0.10.0
libtpu: 0.0.40
codegen_flags: <defaults>
</compile_context>

<pallas_src>
import functools

import jax
import jax.numpy as jnp
from jax.experimental import pallas as pl
from jax.experimental.pallas import tpu as pltpu


# ---------------------------------------------------------------------------
# Generic tiled matmul kernel with fused epilogue (none / bias+relu / bias+log_softmax)
# ---------------------------------------------------------------------------
def _matmul_epilogue_kernel(bias_ref, a_ref, b_ref, o_ref, acc_ref, *,
                            epilogue, valid_cols):
    k = pl.program_id(2)
    nk = pl.num_programs(2)

    @pl.when(k == 0)
    def _init():
        acc_ref[...] = jnp.zeros_like(acc_ref)

    acc_ref[...] += jnp.dot(a_ref[...], b_ref[...],
                            preferred_element_type=jnp.float32)

    @pl.when(k == nk - 1)
    def _finalize():
        acc = acc_ref[...]
        if epilogue == "none":
            out = acc
        elif epilogue == "relu":
            out = jnp.maximum(acc + bias_ref[...], 0.0)
        elif epilogue == "log_softmax":
            logits = acc + bias_ref[...]
            # mask lanes beyond the true class count (padding) to a huge negative
            lane = jax.lax.broadcasted_iota(jnp.int32, logits.shape, 1)
            logits = jnp.where(lane < valid_cols, logits,
                               jnp.full_like(logits, -1e30))
            m = jnp.max(logits, axis=-1, keepdims=True)      # (tm, 1), stays in XLU
            e = jnp.exp(logits - m)                          # EUP
            s = jnp.sum(e, axis=-1, keepdims=True)           # (tm, 1)
            out = logits - m - jnp.log(s)
        else:
            raise ValueError(f"unknown epilogue {epilogue!r}")
        o_ref[...] = out.astype(o_ref.dtype)


def graphconv_matmul(a, b, bias=None, *, epilogue="none", valid_cols=None,
                     out_dtype=jnp.bfloat16):
    """out = epilogue(a @ b + bias).  All dims must be multiples of 128."""
    M, K = a.shape
    Kb, N = b.shape
    assert K == Kb, (a.shape, b.shape)
    if bias is None:
        bias = jnp.zeros((1, N), jnp.float32)
    if valid_cols is None:
        valid_cols = N

    # Tile choice: moderate tiles that fit comfortably in scoped VMEM on
    # v5e / v6e / v7x (worst case ~1.5 MiB of double-buffered bf16 tiles + f32 acc).
    tm = 256 if M % 256 == 0 else 128
    tk = 512 if K % 512 == 0 else (256 if K % 256 == 0 else 128)
    if epilogue == "log_softmax":
        tn = N            # whole (padded) class row in one tile for the row reduction
    else:
        tn = 256 if N % 256 == 0 else 128
    assert M % tm == 0 and N % tn == 0 and K % tk == 0

    grid = (M // tm, N // tn, K // tk)
    kernel = functools.partial(_matmul_epilogue_kernel,
                               epilogue=epilogue, valid_cols=int(valid_cols))

    return pl.pallas_call(
        kernel,
        out_shape=jax.ShapeDtypeStruct((M, N), out_dtype),
        grid_spec=pltpu.PrefetchScalarGridSpec(
            num_scalar_prefetch=0,
            grid=grid,
            in_specs=[
                pl.BlockSpec((1, tn), lambda i, j, k: (0, j)),    # bias
                pl.BlockSpec((tm, tk), lambda i, j, k: (i, k)),   # a
                pl.BlockSpec((tk, tn), lambda i, j, k: (k, j)),   # b
            ],
            out_specs=pl.BlockSpec((tm, tn), lambda i, j, k: (i, j)),
            scratch_shapes=[pltpu.VMEM((tm, tn), jnp.float32)],
        ),
        compiler_params=pltpu.CompilerParams(
            dimension_semantics=("parallel", "parallel", "arbitrary")),
    )(bias, a, b)


# ---------------------------------------------------------------------------
# JAX glue: BN folding, padding, graph normalization
# ---------------------------------------------------------------------------
def _round_up(x, m):
    return (x + m - 1) // m * m


def _pad2(x, rows, cols):
    return jnp.pad(x, ((0, rows - x.shape[0]), (0, cols - x.shape[1])))


def _fold_bn(W, b, gamma, beta, mean, var, eps=1e-5):
    """Fold eval-mode BatchNorm1d into the preceding (W, b)."""
    scale = gamma * jax.lax.rsqrt(var + eps)
    return W * scale[None, :], (b - mean) * scale + beta


def prepare_inputs(A_hat, feats, W1, b1, W2, b2, bn1, bn2):
    W1f, b1f = _fold_bn(W1, b1, *bn1)
    W2f, b2f = _fold_bn(W2, b2, *bn2)

    n = A_hat.shape[0]
    fin, fh = W1.shape
    fout = W2.shape[1]
    n_p = _round_up(n, 128)
    fin_p, fh_p, fout_p = (_round_up(d, 128) for d in (fin, fh, fout))

    return dict(
        A=_pad2(A_hat, n_p, n_p).astype(jnp.bfloat16),
        X=_pad2(feats, n_p, fin_p).astype(jnp.bfloat16),
        W1=_pad2(W1f, fin_p, fh_p).astype(jnp.bfloat16),
        b1=jnp.pad(b1f, (0, fh_p - fh)).reshape(1, fh_p).astype(jnp.float32),
        W2=_pad2(W2f, fh_p, fout_p).astype(jnp.bfloat16),
        b2=jnp.pad(b2f, (0, fout_p - fout)).reshape(1, fout_p).astype(jnp.float32),
        n_nodes=int(n), n_classes=int(fout),
    )


def gnn_forward_pallas(p):
    # ----- layer 1: project first (cheap), then (N,N) aggregation + bias + ReLU -----
    z1 = graphconv_matmul(p["X"], p["W1"], epilogue="none", out_dtype=jnp.bfloat16)
    h1 = graphconv_matmul(p["A"], z1, p["b1"], epilogue="relu",
                          out_dtype=jnp.bfloat16)
    # feature dropout: eval mode -> identity (nothing to do)
    # ----- layer 2: project, then aggregation + bias + log_softmax -----
    z2 = graphconv_matmul(h1, p["W2"], epilogue="none", out_dtype=jnp.bfloat16)
    out = graphconv_matmul(p["A"], z2, p["b2"], epilogue="log_softmax",
                           valid_cols=p["n_classes"], out_dtype=jnp.float32)
    return out[:p["n_nodes"], :p["n_classes"]]


def gnn_forward_reference(p):
    """Pure-JAX reference with the same bf16 operand quantization."""
    f32 = jnp.float32
    z1 = jnp.dot(p["X"], p["W1"], preferred_element_type=f32).astype(jnp.bfloat16)
    h1 = jnp.maximum(jnp.dot(p["A"], z1, preferred_element_type=f32) + p["b1"],
                     0.0).astype(jnp.bfloat16)
    z2 = jnp.dot(h1, p["W2"], preferred_element_type=f32).astype(jnp.bfloat16)
    logits = jnp.dot(p["A"], z2, preferred_element_type=f32) + p["b2"]
    logits = logits[:p["n_nodes"], :p["n_classes"]]
    return jax.nn.log_softmax(logits, axis=1)


# ---------------------------------------------------------------------------
# Example run
# ---------------------------------------------------------------------------
if __name__ == "__main__":
    N_NODES, N_EDGES = 100, 400
    INPUT_DIM, HIDDEN_DIM, OUTPUT_DIM = 10, 16, 7
    EDGE_DROPOUT_RATE = 0.2

    key = jax.random.PRNGKey(0)
    ks = jax.random.split(key, 8)
    feats = jax.random.normal(ks[0], (N_NODES, INPUT_DIM), jnp.float32)
    src = jax.random.randint(ks[1], (N_EDGES,), 0, N_NODES)
    dst = jax.random.randint(ks[2], (N_EDGES,), 0, N_NODES)
    W1 = 0.3 * jax.random.normal(ks[3], (INPUT_DIM, HIDDEN_DIM), jnp.float32)
    b1 = 0.1 * jax.random.normal(ks[4], (HIDDEN_DIM,), jnp.float32)
    W2 = 0.3 * jax.random.normal(ks[5], (HIDDEN_DIM, OUTPUT_DIM), jnp.float32)
    b2 = 0.1 * jax.random.normal(ks[6], (OUTPUT_DIM,), jnp.float32)

    # eval-mode BatchNorm params: (gamma, beta, running_mean, running_var)
    bn1 = (jnp.ones(HIDDEN_DIM), jnp.zeros(HIDDEN_DIM),
           jnp.zeros(HIDDEN_DIM), jnp.ones(HIDDEN_DIM))
    bn2 = (jnp.ones(OUTPUT_DIM), jnp.zeros(OUTPUT_DIM),
           jnp.zeros(OUTPUT_DIM), jnp.ones(OUTPUT_DIM))

    # Edge dropout (deterministic key, kept edges NOT rescaled -> dgl.edge_subgraph),
    # applied BEFORE degree normalization.
    keep = (jax.random.uniform(ks[7], (N_EDGES,)) > EDGE_DROPOUT_RATE).astype(jnp.float32)
    A = jnp.zeros((N_NODES, N_NODES), jnp.float32).at[dst, src].add(keep)

    # DGL GraphConv norm='both' on the (edge-dropped) graph.
    out_deg = A.sum(axis=0)     # out-degree of source nodes
    in_deg = A.sum(axis=1)      # in-degree of destination nodes
    out_norm = jnp.where(out_deg > 0, jax.lax.rsqrt(out_deg), 0.0)
    in_norm = jnp.where(in_deg > 0, jax.lax.rsqrt(in_deg), 0.0)
    A_hat = in_norm[:, None] * A * out_norm[None, :]

    prep = prepare_inputs(A_hat, feats, W1, b1, W2, b2, bn1, bn2)

    out = gnn_forward_pallas(prep)
    out = jax.block_until_ready(out)

    ref = gnn_forward_reference(prep)
    assert out.shape == (N_NODES, OUTPUT_DIM), out.shape
    assert bool(jnp.all(jnp.isfinite(out)))
    assert bool(jnp.allclose(out, ref, atol=3e-2, rtol=3e-2)), \
        float(jnp.max(jnp.abs(out - ref)))

    print("KERNEL_OK")
</pallas_src>

<mosaic_0001>
module attributes {stable_mosaic.version = 11 : i64} {
  func.func @_matmul_epilogue_kernel(%arg0: i32, %arg1: i32, %arg2: i32, %arg3: memref<1x128xf32, #tpu.memory_space<vmem>>, %arg4: memref<128x128xbf16, #tpu.memory_space<vmem>>, %arg5: memref<128x128xbf16, #tpu.memory_space<vmem>>, %arg6: memref<128x128xbf16, #tpu.memory_space<vmem>>, %arg7: memref<128x128xf32, #tpu.memory_space<vmem>>) attributes {dimension_semantics = [#tpu.dimension_semantics<parallel>, #tpu.dimension_semantics<parallel>, #tpu.dimension_semantics<arbitrary>], iteration_bounds = array<i64: 1, 1, 1>, scalar_prefetch = 0 : i64, scratch_operands = 1 : i64, tpu.core_type = #tpu.core_type<tc>, window_params = [{transform_indices = @transform_0, window_bounds = array<i64: 1, 128>}, {transform_indices = @transform_1, window_bounds = array<i64: 128, 128>}, {transform_indices = @transform_2, window_bounds = array<i64: 128, 128>}, {transform_indices = @transform_3, window_bounds = array<i64: 128, 128>}]} {
    %c0_i32 = arith.constant 0 : i32
    %0 = arith.cmpi eq, %arg2, %c0_i32 : i32
    %1 = arith.extui %0 : i1 to i32
    %c0_i32_0 = arith.constant 0 : i32
    %2 = arith.cmpi ne, %1, %c0_i32_0 : i32
    scf.if %2 {
      %cst_10 = arith.constant 0.000000e+00 : f32
      %12 = vector.broadcast %cst_10 : f32 to vector<128x128xf32>
      %c0_11 = arith.constant 0 : index
      %c0_12 = arith.constant 0 : index
      %13 = vector.load %arg7[%c0_11, %c0_12] : memref<128x128xf32, #tpu.memory_space<vmem>>, vector<128x128xf32>
      tpu.vector_store %arg7[%c0_11, %c0_12], %12 {strides = array<i32>} : memref<128x128xf32, #tpu.memory_space<vmem>>, vector<128x128xf32>,
    } else {
    }
    %c0 = arith.constant 0 : index
    %c0_1 = arith.constant 0 : index
    %3 = vector.load %arg7[%c0, %c0_1] : memref<128x128xf32, #tpu.memory_space<vmem>>, vector<128x128xf32>
    %c0_2 = arith.constant 0 : index
    %c0_3 = arith.constant 0 : index
    %4 = vector.load %arg4[%c0_2, %c0_3] : memref<128x128xbf16, #tpu.memory_space<vmem>>, vector<128x128xbf16>
    %c0_4 = arith.constant 0 : index
    %c0_5 = arith.constant 0 : index
    %5 = vector.load %arg5[%c0_4, %c0_5] : memref<128x128xbf16, #tpu.memory_space<vmem>>, vector<128x128xbf16>
    %cst = arith.constant dense<0.000000e+00> : vector<128x128xf32>
    %6 = tpu.matmul %4, %5, %cst {dimension_numbers = #tpu.dot_dimension_numbers<[1], [0], [0], [1], [0, 0, 1, 1], [], []>} : vector<128x128xbf16>, vector<128x128xbf16>, vector<128x128xf32> -> vector<128x128xf32>
    %7 = arith.addf %3, %6 : vector<128x128xf32>
    %c0_6 = arith.constant 0 : index
    %c0_7 = arith.constant 0 : index
    %8 = vector.load %arg7[%c0_6, %c0_7] : memref<128x128xf32, #tpu.memory_space<vmem>>, vector<128x128xf32>
    tpu.vector_store %arg7[%c0_6, %c0_7], %7 {strides = array<i32>} : memref<128x128xf32, #tpu.memory_space<vmem>>, vector<128x128xf32>,
    %c0_i32_8 = arith.constant 0 : i32
    %9 = arith.cmpi eq, %arg2, %c0_i32_8 : i32
    %10 = arith.extui %9 : i1 to i32
    %c0_i32_9 = arith.constant 0 : i32
    %11 = arith.cmpi ne, %10, %c0_i32_9 : i32
    scf.if %11 {
      %c0_10 = arith.constant 0 : index
      %c0_11 = arith.constant 0 : index
      %12 = vector.load %arg7[%c0_10, %c0_11] : memref<128x128xf32, #tpu.memory_space<vmem>>, vector<128x128xf32>
      %13 = arith.truncf %12 : vector<128x128xf32> to vector<128x128xbf16>
      %c0_12 = arith.constant 0 : index
      %c0_13 = arith.constant 0 : index
      %14 = vector.load %arg6[%c0_12, %c0_13] : memref<128x128xbf16, #tpu.memory_space<vmem>>, vector<128x128xbf16>
      tpu.vector_store %arg6[%c0_12, %c0_13], %13 {strides = array<i32>} : memref<128x128xbf16, #tpu.memory_space<vmem>>, vector<128x128xbf16>,
    } else {
    }
    return
  }
  func.func @transform_0(%arg0: i32, %arg1: i32, %arg2: i32) -> (i32, i32) {
    %c0_i32 = arith.constant 0 : i32
    %c0_i32_0 = arith.constant 0 : i32
    return %c0_i32, %arg1 : i32, i32
  }
  func.func @transform_1(%arg0: i32, %arg1: i32, %arg2: i32) -> (i32, i32) {
    %c0_i32 = arith.constant 0 : i32
    return %arg0, %arg2 : i32, i32
  }
  func.func @transform_2(%arg0: i32, %arg1: i32, %arg2: i32) -> (i32, i32) {
    %c0_i32 = arith.constant 0 : i32
    return %arg2, %arg1 : i32, i32
  }
  func.func @transform_3(%arg0: i32, %arg1: i32, %arg2: i32) -> (i32, i32) {
    %c0_i32 = arith.constant 0 : i32
    return %arg0, %arg1 : i32, i32
  }
}

</mosaic_0001>

<bundles_post_ra>
// kernel: tpu_custom_call.1
= control target key start
LH: loop header
LB: loop body
LE: loop exit
PB: predicated region body
PF: predicated region fallthrough
CT: control target
= control target key end

     0   :  { %8 = vsyncpa [#allocation4], 0  ;;  %s682_s0 = inlined_call_operand.hbm [shape: f32[1,128], index: 0, kind: input, shape index: {}]   ;;  %s683_s1 = inlined_call_operand.hbm [shape: bf16[128,128], index: 1, kind: input, shape index: {}]   ;;  %s684_s2 = inlined_call_operand.hbm [shape: bf16[128,128], index: 2, kind: input, shape index: {}]   ;;  %s685_s3 = inlined_call_operand.hbm [shape: bf16[128,128], index: 3, kind: output, shape index: {}]  }
   0x1   :  { %9 = vsyncpa [#allocation7], 0  ;;  %s26_s14 = sshll.u32 %s683_s1, 4  ;;  %s27_s14 = int_to_ptr.hbm [resolvable:$true] %s26_s14 }
   0x2   :  { %10 = vsyncpa [#allocation5], 0  ;;  %s635_s15 = smov [#allocation6]   ;;  %s16_s19 = sshll.u32 %s682_s0, 4  ;;  %s17_s19 = int_to_ptr.hbm [resolvable:$true] %s16_s19 }
   0x3   :  { %s28_s16 = sshll.u32 %s635_s15, 4  ;;  %s636_s20 = smov 64   ;;  %s29_s16 = int_to_ptr.vmem [resolvable:$true] %s28_s16 }
   0x4   :  { %s637_s21 = smov 4   ;;  %s638_s22 = smov [#allocation3]  }
   0x5   :  { %34 = dma.hbm_to_vmem [thread:$0]  %s27_s14, 1024, %s29_s16, [#allocation7], %s636_s20, %s636_s20, %s637_s21  }
   0x6   :  { %s18_s23 = sshll.u32 %s638_s22, 4  ;;  %s39_s25 = sshll.u32 %s684_s2, 4  ;;  %s19_s23 = int_to_ptr.vmem [resolvable:$true] %s18_s23  ;;  %s40_s25 = int_to_ptr.hbm [resolvable:$true] %s39_s25 }
   0x7   :  { %21 = dma.hbm_to_vmem [thread:$0]  %s17_s19, 16, %s19_s23, [#allocation4]  }
   0x8   :  { %s639_s26 = smov [#allocation8]  }
   0x9   :  { %s41_s27 = sshll.u32 %s639_s26, 4  ;;  %s42_s27 = int_to_ptr.vmem [resolvable:$true] %s41_s27 }
   0xa   :  { %47 = dma.hbm_to_vmem [thread:$0]  %s40_s25, 1024, %s42_s27, [#allocation7], %s636_s20, %s636_s20, %s637_s21  }
   0xb   :  { %629 = dma.done.wait [#allocation4], 16  }
   0xc   :  { %630 = vsyncadd [#allocation4], 4294967280 }
   0xd   :  { %631 = dma.done.wait [#allocation7], 2048  }
   0xe   :  { %632 = vsyncadd [#allocation7], 4294965248  ;;  %v455_v0 = vld [vmem:[#allocation8 + $0x38] sm:$0xff]  ;;  %v454_v1 = vld [vmem:[#allocation8 + $0x30] sm:$0xff]  ;;  %s640_s0 = smov [#allocation9]   ;;  %s362_s30 = sshll.u32 %s685_s3, 4  ;;  %s363_s30 = int_to_ptr.hbm [resolvable:$true] %s362_s30 }
   0xf   :  { %224 = vmatpush.bf16.msra.mxu0 %v455_v0  ;;  %503 = vmatpush.bf16.msra.mxu1 %v455_v0  ;;  %v453_v2 = vld [vmem:[#allocation8 + $0x28] sm:$0xff]  ;;  %v452_v3 = vld [vmem:[#allocation8 + $0x20] sm:$0xff]  ;;  %v451_v4 = vld [vmem:[#allocation8 + $0x18] sm:$0xff]  ;;  %s360_s2 = sshll.u32 %s640_s0, 4  ;;  %s361_s2 = int_to_ptr.vmem [resolvable:$true] %s360_s2 }
  0x10   :  { %504 = vmatpush.bf16.msra.mxu2 %v455_v0  ;;  %505 = vmatpush.bf16.msra.mxu3 %v455_v0  ;;  %v450_v5 = vld [vmem:[#allocation8 + $0x10] sm:$0xff]  ;;  %v449_v6 = vld [vmem:[#allocation8 + $0x8] sm:$0xff]  ;;  %v448_v7 = vld [vmem:[#allocation8] sm:$0xff] }
  0x11   :  { %v440_v8 = vld [vmem:[#allocation6] sm:$0xff]  ;;  %v442_v9 = vld [vmem:[#allocation6 + $0x10] sm:$0xff]  ;;  %v441_v12 = vld [vmem:[#allocation6 + $0x8] sm:$0xff] }
  0x12   :  { %v444_v10 = vld [vmem:[#allocation6 + $0x20] sm:$0xff]  ;;  %v446_v11 = vld [vmem:[#allocation6 + $0x30] sm:$0xff]  ;;  %v443_v13 = vld [vmem:[#allocation6 + $0x18] sm:$0xff] }
  0x13   :  { %225 = vmatpush.bf16.msra.mxu0 %v454_v1  ;;  %506 = vmatpush.bf16.msra.mxu1 %v454_v1  ;;  %v445_v14 = vld [vmem:[#allocation6 + $0x28] sm:$0xff]  ;;  %v447_v15 = vld [vmem:[#allocation6 + $0x38] sm:$0xff] }
  0x14   :  { %507 = vmatpush.bf16.msra.mxu2 %v454_v1  ;;  %508 = vmatpush.bf16.msra.mxu3 %v454_v1 }
  0x17   :  { %226 = vmatpush.bf16.msra.mxu0 %v453_v2  ;;  %509 = vmatpush.bf16.msra.mxu1 %v453_v2 }
  0x18   :  { %510 = vmatpush.bf16.msra.mxu2 %v453_v2  ;;  %511 = vmatpush.bf16.msra.mxu3 %v453_v2 }
  0x1b   :  { %227 = vmatpush.bf16.msra.mxu0 %v452_v3  ;;  %512 = vmatpush.bf16.msra.mxu1 %v452_v3 }
  0x1c   :  { %513 = vmatpush.bf16.msra.mxu2 %v452_v3  ;;  %514 = vmatpush.bf16.msra.mxu3 %v452_v3 }
  0x1f   :  { %228 = vmatpush.bf16.msra.mxu0 %v451_v4  ;;  %515 = vmatpush.bf16.msra.mxu1 %v451_v4 }
  0x20   :  { %516 = vmatpush.bf16.msra.mxu2 %v451_v4  ;;  %517 = vmatpush.bf16.msra.mxu3 %v451_v4 }
  0x23   :  { %229 = vmatpush.bf16.msra.mxu0 %v450_v5  ;;  %518 = vmatpush.bf16.msra.mxu1 %v450_v5 }
  0x24   :  { %519 = vmatpush.bf16.msra.mxu2 %v450_v5  ;;  %520 = vmatpush.bf16.msra.mxu3 %v450_v5 }
  0x27   :  { %230 = vmatpush.bf16.msra.mxu0 %v449_v6  ;;  %521 = vmatpush.bf16.msra.mxu1 %v449_v6 }
  0x28   :  { %522 = vmatpush.bf16.msra.mxu2 %v449_v6  ;;  %523 = vmatpush.bf16.msra.mxu3 %v449_v6 }
  0x2b   :  { %231 = vmatpush.bf16.msra.mxu0 %v448_v7  ;;  %524 = vmatpush.bf16.msra.mxu1 %v448_v7 }
  0x2c   :  { %525 = vmatpush.bf16.msra.mxu2 %v448_v7  ;;  %526 = vmatpush.bf16.msra.mxu3 %v448_v7 }
  0x2e   :  { %232 = vmatmul.bf16.vlgmr.msra.gmra.mxu0 %v440_v8  ;;  %242 = vmatmul.bf16.vlgmr.msra.gmra.mxu1 %v442_v9 }
  0x2f   :  { %252 = vmatmul.bf16.vlgmr.msra.gmra.mxu2 %v444_v10  ;;  %262 = vmatmul.bf16.vlgmr.msra.gmra.mxu3 %v446_v11 }
  0x3e   :  { %237 = vmatmul.bf16.gmra.mxu0 %v441_v12  ;;  %247 = vmatmul.bf16.gmra.mxu1 %v443_v13 }
  0x3f   :  { %257 = vmatmul.bf16.gmra.mxu2 %v445_v14  ;;  %267 = vmatmul.bf16.gmra.mxu3 %v447_v15 }
  0xab   :  { %v233_v16 = vpop.f32.mrf.mxu0  ;;  %v243_v17 = vpop.f32.mrf.mxu1 }
  0xb2   :  { %v253_v18 = vpop.f32.mrf.mxu2  ;;  %v263_v19 = vpop.f32.mrf.mxu3 }
  0xb3   :  { %v235_v20 = vpop.f32.mrf.mxu0  ;;  %v245_v21 = vpop.f32.mrf.mxu1 }
  0xb4   :  { %v459_v22 = vpack.c.bf16 %v235_v20, %v233_v16  ;;  %v469_v23 = vpack.c.bf16 %v245_v21, %v243_v17 }
  0xb6   :  { %460 = vst [vmem:[#allocation9] sm:$0xff] %v459_v22  }
  0xb7   :  { %497 = vst [vmem:[#allocation9 + $0x10] sm:$0xff] %v469_v23  }
  0xba   :  { %v255_v24 = vpop.f32.mrf.mxu2  ;;  %v265_v25 = vpop.f32.mrf.mxu3 }
  0xbb   :  { %v479_v26 = vpack.c.bf16 %v255_v24, %v253_v18  ;;  %v489_v27 = vpack.c.bf16 %v265_v25, %v263_v19  ;;  %v238_v28 = vpop.f32.mrf.mxu0  ;;  %v248_v29 = vpop.f32.mrf.mxu1 }
  0xbd   :  { %499 = vst [vmem:[#allocation9 + $0x20] sm:$0xff] %v479_v26  }
  0xbe   :  { %501 = vst [vmem:[#allocation9 + $0x30] sm:$0xff] %v489_v27  }
  0xc2   :  { %v258_v30 = vpop.f32.mrf.mxu2  ;;  %v268_v31 = vpop.f32.mrf.mxu3 }
  0xc3   :  { %v240_v32 = vpop.f32.mrf.mxu0  ;;  %v250_v33 = vpop.f32.mrf.mxu1 }
  0xc4   :  { %v464_v34 = vpack.c.bf16 %v240_v32, %v238_v28  ;;  %v474_v35 = vpack.c.bf16 %v250_v33, %v248_v29 }
  0xc6   :  { %496 = vst [vmem:[#allocation9 + $0x8] sm:$0xff] %v464_v34  }
  0xc7   :  { %498 = vst [vmem:[#allocation9 + $0x18] sm:$0xff] %v474_v35  }
  0xca   :  { %v260_v36 = vpop.f32.mrf.mxu2  ;;  %v270_v37 = vpop.f32.mrf.mxu3 }
  0xcb   :  { %v484_v38 = vpack.c.bf16 %v260_v36, %v258_v30  ;;  %v494_v39 = vpack.c.bf16 %v270_v37, %v268_v31 }
  0xcd   :  { %500 = vst [vmem:[#allocation9 + $0x28] sm:$0xff] %v484_v38  }
  0xce   :  { %502 = vst [vmem:[#allocation9 + $0x38] sm:$0xff] %v494_v39  }
  0xcf   :  { %368 = dma.vmem_to_hbm [thread:$0]  %s361_s2, 1024, %s363_s30, [#allocation5], %s636_s20, %s636_s20, %s637_s21  }
  0xd0   :  { %633 = dma.done.wait [#allocation5], 1024  }
  0xd1   :  { %634 = vsyncadd [#allocation5], 4294966272 }
  0xd2   :  { %373 = vsyncpa [#allocation4], 1 }
  0xd3   :  { %374 = vsyncpa [#allocation7], 1 }
  0xd4   :  { %375 = vsyncpa [#allocation5], 1 }

</bundles_post_ra>
